<compile_context>
chip_gen: v5e
topology: v5e:2x2
jax: 0.10.0
libtpu: 0.0.40
codegen_flags: <defaults>
</compile_context>

<pallas_src>
import functools

import jax
import jax.numpy as jnp
from jax.experimental import pallas as pl
from jax.experimental.pallas import tpu as pltpu


def _att_mlp_kernel(x_ref, w1_ref, b1_ref, w2_ref, b2_ref, o_ref):
    # Linear(128 -> 64) + ReLU.  MXU matmul, f32 accumulation.
    h = jnp.dot(x_ref[...], w1_ref[...], preferred_element_type=jnp.float32)
    h = jnp.maximum(h + b1_ref[...].astype(jnp.float32), 0.0)
    # Linear(64 -> out_dim) + ReLU.  Only downcast the hidden activation when
    # the weights are actually stored narrow (no-op in the f32 config).
    if w2_ref.dtype != jnp.float32:
        h = h.astype(w2_ref.dtype)
    y = jnp.dot(h, w2_ref[...], preferred_element_type=jnp.float32)
    y = jnp.maximum(y + b2_ref[...].astype(jnp.float32), 0.0)
    o_ref[...] = y.astype(o_ref.dtype)


def _round_up(x, m):
    return ((x + m - 1) // m) * m


def _choose_block_b(batch, in_dim, hidden, out_dim, itemsize,
                    vmem_tile_budget=24 << 20, max_block=4096):
    """Pick a batch tile: as large as the VMEM budget allows, sublane-aligned,
    >= 2 grid steps for big batches (v7x megacore), no oversizing for small B."""
    min_tile = 16 if itemsize < 4 else 8          # bf16 needs 16-row sublane tiles
    # Resident weight blocks eat into the budget (W2 can be wide).
    weight_bytes = ((in_dim + 1) * hidden + (hidden + 1) * out_dim) * itemsize
    budget = max(vmem_tile_budget - 2 * weight_bytes, 1 << 20)
    per_row = 2 * (in_dim + out_dim) * itemsize   # double-buffered x + out tiles
    cap = max(min_tile, budget // per_row)
    block = min(max_block, cap)
    if batch >= 1024:
        # Keep at least 2 grid steps so the parallel batch axis can be
        # sharded across both v7x TensorCores.
        block = min(block, _round_up(-(-batch // 2), min_tile))
    block = max(min_tile, (block // min_tile) * min_tile)
    # Don't make the tile (and hence VMEM footprint) bigger than B needs.
    block = min(block, _round_up(batch, min_tile))
    return block


def attentional_weights_forward(attention, params, *, num_classes, feature_dim,
                                attention_type, block_b=None):
    """JAX/Pallas equivalent of AttentionalWeights.forward."""
    if attention_type is None:
        return None

    w1, b1, w2, b2 = params  # w1:(128,64) b1:(1,64) w2:(64,out) b2:(1,out)
    B, in_dim = attention.shape
    assert in_dim == w1.shape[0]
    hidden = w1.shape[1]
    out_dim = w2.shape[1]
    dtype = attention.dtype
    itemsize = jnp.dtype(dtype).itemsize

    if block_b is None:
        block_b = _choose_block_b(B, in_dim, hidden, out_dim, itemsize)
    min_tile = 16 if itemsize < 4 else 8
    assert block_b % min_tile == 0, "block_b must be sublane-aligned"

    # Non-divisible batch is handled by Pallas partial-block clipping: the
    # MLP is row-independent, OOB rows of the last tile are never written.
    grid = (pl.cdiv(B, block_b),)

    weight_bytes = sum(int(p.size) * jnp.dtype(p.dtype).itemsize for p in params)
    cost = pl.CostEstimate(
        flops=2 * B * (in_dim * hidden + hidden * out_dim),
        transcendentals=0,
        bytes_accessed=B * (in_dim + out_dim) * itemsize + weight_bytes,
    )

    # TODO(synk): if out_dim (feature_dim*num_classes) ever gets huge (>~10K),
    # add a second grid axis tiling out_dim / W2 instead of shrinking block_b.
    out = pl.pallas_call(
        _att_mlp_kernel,
        out_shape=jax.ShapeDtypeStruct((B, out_dim), dtype),
        grid_spec=pltpu.PrefetchScalarGridSpec(
            num_scalar_prefetch=0,
            grid=grid,
            in_specs=[
                pl.BlockSpec((block_b, in_dim), lambda i: (i, 0)),   # x tile (streamed)
                pl.BlockSpec((in_dim, hidden), lambda i: (0, 0)),    # W1 (resident)
                pl.BlockSpec((1, hidden), lambda i: (0, 0)),         # b1 (resident)
                pl.BlockSpec((hidden, out_dim), lambda i: (0, 0)),   # W2 (resident)
                pl.BlockSpec((1, out_dim), lambda i: (0, 0)),        # b2 (resident)
            ],
            out_specs=pl.BlockSpec((block_b, out_dim), lambda i: (i, 0)),
        ),
        compiler_params=pltpu.CompilerParams(
            dimension_semantics=("parallel",),
            vmem_limit_bytes=40 << 20,   # above v5e's 16 MiB default, under v7x's 64 MiB
        ),
        cost_estimate=cost,
    )(attention, w1, b1, w2, b2)

    if attention_type == 'single_head':
        return out.reshape(-1, feature_dim, 1)
    return out.reshape(-1, feature_dim, num_classes)


def init_params(key, *, num_classes, feature_dim, attention_type,
                dtype=jnp.float32):
    """Deterministic synthetic parameters matching the nn.Linear shapes."""
    if attention_type == 'multi_head':
        out_dim = feature_dim * num_classes
    elif attention_type == 'single_head':
        out_dim = feature_dim
    else:
        return None
    k1, k2, k3, k4 = jax.random.split(key, 4)
    w1 = jax.random.uniform(k1, (128, 64), dtype, -1.0 / 128 ** 0.5, 1.0 / 128 ** 0.5)
    b1 = jax.random.uniform(k2, (1, 64), dtype, -1.0 / 128 ** 0.5, 1.0 / 128 ** 0.5)
    w2 = jax.random.uniform(k3, (64, out_dim), dtype, -1.0 / 64 ** 0.5, 1.0 / 64 ** 0.5)
    b2 = jax.random.uniform(k4, (1, out_dim), dtype, -1.0 / 64 ** 0.5, 1.0 / 64 ** 0.5)
    return (w1, b1, w2, b2)


def _reference(attention, params):
    """Pure-JAX reference of the same MLP (correctness check)."""
    w1, b1, w2, b2 = params
    h = jnp.maximum(attention @ w1 + b1, 0.0)
    return jnp.maximum(h @ w2 + b2, 0.0)


if __name__ == "__main__":
    key = jax.random.PRNGKey(0)

    # --- multi_head path: out_dim = feature_dim * num_classes = 128 (lane-dense) ---
    num_classes, feature_dim = 4, 32
    batch = 8
    k_x, k_p, key = jax.random.split(key, 3)
    attention = jax.random.normal(k_x, (batch, 128), jnp.float32)
    params = init_params(k_p, num_classes=num_classes, feature_dim=feature_dim,
                         attention_type='multi_head')
    fwd = functools.partial(attentional_weights_forward,
                            num_classes=num_classes, feature_dim=feature_dim,
                            attention_type='multi_head')
    out = jax.block_until_ready(jax.jit(fwd)(attention, params))
    assert out.shape == (batch, feature_dim, num_classes), out.shape
    ref = _reference(attention, params).reshape(-1, feature_dim, num_classes)
    assert jnp.allclose(out, ref, atol=1e-5, rtol=1e-5), "multi_head mismatch"

    # --- single_head path + non-tile-multiple batch (exercises partial block) ---
    feature_dim_s = 32
    batch_s = 50
    k_x2, k_p2, key = jax.random.split(key, 3)
    attention_s = jax.random.normal(k_x2, (batch_s, 128), jnp.float32)
    params_s = init_params(k_p2, num_classes=1, feature_dim=feature_dim_s,
                           attention_type='single_head')
    fwd_s = functools.partial(attentional_weights_forward,
                              num_classes=1, feature_dim=feature_dim_s,
                              attention_type='single_head')
    out_s = jax.block_until_ready(jax.jit(fwd_s)(attention_s, params_s))
    assert out_s.shape == (batch_s, feature_dim_s, 1), out_s.shape
    ref_s = _reference(attention_s, params_s).reshape(-1, feature_dim_s, 1)
    assert jnp.allclose(out_s, ref_s, atol=1e-5, rtol=1e-5), "single_head mismatch"

    # --- multi-tile batch (exercises grid > 1 and a ragged last tile) ---
    batch_l = 515
    k_x3, k_p3, key = jax.random.split(key, 3)
    attention_l = jax.random.normal(k_x3, (batch_l, 128), jnp.float32)
    out_l = jax.block_until_ready(
        jax.jit(functools.partial(fwd, block_b=128))(attention_l, params))
    ref_l = _reference(attention_l, params).reshape(-1, feature_dim, num_classes)
    assert jnp.allclose(out_l, ref_l, atol=1e-5, rtol=1e-5), "large-batch mismatch"

    # attention_type=None returns None, like the PyTorch module.
    assert attentional_weights_forward(attention, params, num_classes=4,
                                       feature_dim=32, attention_type=None) is None

    print("KERNEL_OK")
</pallas_src>

<mosaic_0001>
module attributes {stable_mosaic.version = 11 : i64} {
  func.func @_att_mlp_kernel(%arg0: i32, %arg1: memref<8x128xf32, #tpu.memory_space<vmem>>, %arg2: memref<128x64xf32, #tpu.memory_space<vmem>>, %arg3: memref<1x64xf32, #tpu.memory_space<vmem>>, %arg4: memref<64x128xf32, #tpu.memory_space<vmem>>, %arg5: memref<1x128xf32, #tpu.memory_space<vmem>>, %arg6: memref<8x128xf32, #tpu.memory_space<vmem>>) attributes {dimension_semantics = [#tpu.dimension_semantics<parallel>], iteration_bounds = array<i64: 1>, scalar_prefetch = 0 : i64, scratch_operands = 0 : i64, tpu.core_type = #tpu.core_type<tc>, window_params = [{transform_indices = @transform_0, window_bounds = array<i64: 8, 128>}, {pipeline_mode = #tpu.pipeline_mode<synchronous>, transform_indices = @transform_1, window_bounds = array<i64: 128, 64>}, {pipeline_mode = #tpu.pipeline_mode<synchronous>, transform_indices = @transform_2, window_bounds = array<i64: 1, 64>}, {pipeline_mode = #tpu.pipeline_mode<synchronous>, transform_indices = @transform_3, window_bounds = array<i64: 64, 128>}, {pipeline_mode = #tpu.pipeline_mode<synchronous>, transform_indices = @transform_4, window_bounds = array<i64: 1, 128>}, {transform_indices = @transform_5, window_bounds = array<i64: 8, 128>}]} {
    %c0 = arith.constant 0 : index
    %c0_0 = arith.constant 0 : index
    %0 = vector.load %arg1[%c0, %c0_0] : memref<8x128xf32, #tpu.memory_space<vmem>>, vector<8x128xf32>
    %c0_1 = arith.constant 0 : index
    %c0_2 = arith.constant 0 : index
    %1 = vector.load %arg2[%c0_1, %c0_2] : memref<128x64xf32, #tpu.memory_space<vmem>>, vector<128x64xf32>
    %cst = arith.constant dense<0.000000e+00> : vector<8x64xf32>
    %2 = tpu.matmul %0, %1, %cst {dimension_numbers = #tpu.dot_dimension_numbers<[1], [0], [0], [1], [0, 0, 1, 1], [], []>} : vector<8x128xf32>, vector<128x64xf32>, vector<8x64xf32> -> vector<8x64xf32>
    %c0_3 = arith.constant 0 : index
    %c0_4 = arith.constant 0 : index
    %3 = vector.load %arg3[%c0_3, %c0_4] : memref<1x64xf32, #tpu.memory_space<vmem>>, vector<1x64xf32>
    %4 = vector.broadcast %3 : vector<1x64xf32> to vector<8x64xf32>
    %5 = arith.addf %2, %4 : vector<8x64xf32>
    %cst_5 = arith.constant 0.000000e+00 : f32
    %6 = vector.broadcast %cst_5 : f32 to vector<8x64xf32>
    %7 = arith.maximumf %5, %6 : vector<8x64xf32>
    %c0_6 = arith.constant 0 : index
    %c0_7 = arith.constant 0 : index
    %8 = vector.load %arg4[%c0_6, %c0_7] : memref<64x128xf32, #tpu.memory_space<vmem>>, vector<64x128xf32>
    %cst_8 = arith.constant dense<0.000000e+00> : vector<8x128xf32>
    %9 = tpu.matmul %7, %8, %cst_8 {dimension_numbers = #tpu.dot_dimension_numbers<[1], [0], [0], [1], [0, 0, 1, 1], [], []>} : vector<8x64xf32>, vector<64x128xf32>, vector<8x128xf32> -> vector<8x128xf32>
    %c0_9 = arith.constant 0 : index
    %c0_10 = arith.constant 0 : index
    %10 = vector.load %arg5[%c0_9, %c0_10] : memref<1x128xf32, #tpu.memory_space<vmem>>, vector<1x128xf32>
    %11 = vector.broadcast %10 : vector<1x128xf32> to vector<8x128xf32>
    %12 = arith.addf %9, %11 : vector<8x128xf32>
    %cst_11 = arith.constant 0.000000e+00 : f32
    %13 = vector.broadcast %cst_11 : f32 to vector<8x128xf32>
    %14 = arith.maximumf %12, %13 : vector<8x128xf32>
    %c0_12 = arith.constant 0 : index
    %c0_13 = arith.constant 0 : index
    %15 = vector.load %arg6[%c0_12, %c0_13] : memref<8x128xf32, #tpu.memory_space<vmem>>, vector<8x128xf32>
    tpu.vector_store %arg6[%c0_12, %c0_13], %14 {strides = array<i32>} : memref<8x128xf32, #tpu.memory_space<vmem>>, vector<8x128xf32>,
    return
  }
  func.func @transform_0(%arg0: i32) -> (i32, i32) {
    %c0_i32 = arith.constant 0 : i32
    %c0_i32_0 = arith.constant 0 : i32
    return %arg0, %c0_i32 : i32, i32
  }
  func.func @transform_1(%arg0: i32) -> (i32, i32) {
    %c0_i32 = arith.constant 0 : i32
    %c0_i32_0 = arith.constant 0 : i32
    %c0_i32_1 = arith.constant 0 : i32
    return %c0_i32, %c0_i32_0 : i32, i32
  }
  func.func @transform_2(%arg0: i32) -> (i32, i32) {
    %c0_i32 = arith.constant 0 : i32
    %c0_i32_0 = arith.constant 0 : i32
    %c0_i32_1 = arith.constant 0 : i32
    return %c0_i32, %c0_i32_0 : i32, i32
  }
  func.func @transform_3(%arg0: i32) -> (i32, i32) {
    %c0_i32 = arith.constant 0 : i32
    %c0_i32_0 = arith.constant 0 : i32
    %c0_i32_1 = arith.constant 0 : i32
    return %c0_i32, %c0_i32_0 : i32, i32
  }
  func.func @transform_4(%arg0: i32) -> (i32, i32) {
    %c0_i32 = arith.constant 0 : i32
    %c0_i32_0 = arith.constant 0 : i32
    %c0_i32_1 = arith.constant 0 : i32
    return %c0_i32, %c0_i32_0 : i32, i32
  }
  func.func @transform_5(%arg0: i32) -> (i32, i32) {
    %c0_i32 = arith.constant 0 : i32
    %c0_i32_0 = arith.constant 0 : i32
    return %arg0, %c0_i32 : i32, i32
  }
}

</mosaic_0001>

<bundles_post_ra>
// kernel: attentional_weights_forward.1
= control target key start
LH: loop header
LB: loop body
LE: loop exit
PB: predicated region body
PF: predicated region fallthrough
CT: control target
= control target key end

     0   :  { %vm74_vm0 = vcmask 523264   ;;  %s221_s1 = inlined_call_operand.vmem [shape: f32[128,64], index: 1, kind: input, shape index: {}]   ;;  %s222_s3 = inlined_call_operand.vmem [shape: f32[64,128], index: 3, kind: input, shape index: {}]   ;;  %s223_s2 = inlined_call_operand.vmem [shape: f32[1,64], index: 2, kind: input, shape index: {}]   ;;  %s224_s0 = inlined_call_operand.vmem [shape: f32[8,128], index: 0, kind: input, shape index: {}]   ;;  %s225_s4 = inlined_call_operand.vmem [shape: f32[1,128], index: 4, kind: input, shape index: {}]   ;;  %s226_s5 = inlined_call_operand.vmem [shape: f32[8,128], index: 5, kind: output, shape index: {}]  }
   0x1   :  { %v36_v0 = vld [vmem:[%s221_s1 + $0x78] sm:$0xff]  ;;  %v35_v1 = vld [vmem:[%s221_s1 + $0x70] sm:$0xff]  ;;  %v34_v2 = vld [vmem:[%s221_s1 + $0x68] sm:$0xff] }
   0x2   :  { %41 = vmatpush.msra.mxu0 %v36_v0  ;;  %v33_v3 = vld [vmem:[%s221_s1 + $0x60] sm:$0xff]  ;;  %v69_v4 = vld [vmem:[%s222_s3 + $0x38] sm:$0xff]  ;;  %v68_v6 = vld [vmem:[%s222_s3 + $0x30] sm:$0xff] }
   0x3   :  { %v32_v5 = vld [vmem:[%s221_s1 + $0x58] sm:$0xff]  ;;  %86 = vmatpush.msra.mxu1 %v69_v4  ;;  %v67_v7 = vld [vmem:[%s222_s3 + $0x28] sm:$0xff]  ;;  %v31_v8 = vld [vmem:[%s221_s1 + $0x50] sm:$0xff] }
   0x4   :  { %42 = vmatpush.msra.mxu0 %v35_v1  ;;  %v66_v9 = vld [vmem:[%s222_s3 + $0x20] sm:$0xff]  ;;  %v30_v10 = vld [vmem:[%s221_s1 + $0x48] sm:$0xff]  ;;  %v65_v11 = vld [vmem:[%s222_s3 + $0x18] sm:$0xff] }
   0x5   :  { %87 = vmatpush.msra.mxu1 %v68_v6  ;;  %v29_v12 = vld [vmem:[%s221_s1 + $0x40] sm:$0xff]  ;;  %v28_v13 = vld [vmem:[%s221_s1 + $0x38] sm:$0xff]  ;;  %v27_v14 = vld [vmem:[%s221_s1 + $0x30] sm:$0xff] }
   0x6   :  { %43 = vmatpush.msra.mxu0 %v34_v2  ;;  %v26_v15 = vld [vmem:[%s221_s1 + $0x28] sm:$0xff]  ;;  %v25_v16 = vld [vmem:[%s221_s1 + $0x20] sm:$0xff]  ;;  %v24_v17 = vld [vmem:[%s221_s1 + $0x18] sm:$0xff] }
   0x7   :  { %88 = vmatpush.msra.mxu1 %v67_v7  ;;  %v23_v18 = vld [vmem:[%s221_s1 + $0x10] sm:$0xff]  ;;  %v22_v19 = vld [vmem:[%s221_s1 + $0x8] sm:$0xff]  ;;  %v21_v20 = vld [vmem:[%s221_s1] sm:$0xff] }
   0x8   :  { %44 = vmatpush.msra.mxu0 %v33_v3  ;;  %v20_v21 = vld [vmem:[%s224_s0] sm:$0xff]  ;;  %v64_v22 = vld [vmem:[%s222_s3 + $0x10] sm:$0xff]  ;;  %v63_v23 = vld [vmem:[%s222_s3 + $0x8] sm:$0xff] }
   0x9   :  { %89 = vmatpush.msra.mxu1 %v66_v9  ;;  %v62_v24 = vld [vmem:[%s222_s3] sm:$0xff] }
   0xa   :  { %45 = vmatpush.msra.mxu0 %v32_v5  ;;  %v105_v25 = vld [vmem:[%s223_s2] ss:$0 sm:$0xff] }
   0xb   :  { %90 = vmatpush.msra.mxu1 %v65_v11  ;;  %v106_v29 = vld [vmem:[%s225_s4] ss:$0 sm:$0xff] }
   0xc   :  { %46 = vmatpush.msra.mxu0 %v31_v8 }
   0xd   :  { %91 = vmatpush.msra.mxu1 %v64_v22 }
   0xe   :  { %47 = vmatpush.msra.mxu0 %v30_v10 }
   0xf   :  { %92 = vmatpush.msra.mxu1 %v63_v23 }
  0x10   :  { %48 = vmatpush.msra.mxu0 %v29_v12 }
  0x11   :  { %93 = vmatpush.msra.mxu1 %v62_v24 }
  0x12   :  { %49 = vmatpush.msra.mxu0 %v28_v13 }
  0x14   :  { %50 = vmatpush.msra.mxu0 %v27_v14 }
  0x16   :  { %51 = vmatpush.msra.mxu0 %v26_v15 }
  0x18   :  { %52 = vmatpush.msra.mxu0 %v25_v16 }
  0x1a   :  { %53 = vmatpush.msra.mxu0 %v24_v17 }
  0x1c   :  { %54 = vmatpush.msra.mxu0 %v23_v18 }
  0x1e   :  { %55 = vmatpush.msra.mxu0 %v22_v19 }
  0x20   :  { %56 = vmatpush.msra.mxu0 %v21_v20 }
  0x21   :  { %57 = vmatmul.f32.vlgmr.msra.gmra.mxu0 %v20_v21 }
  0x9e   :  { %v58_v26 = vpop.f32.mrf.mxu0 }
  0x9f   :  { %v59_v27 = vadd.f32 %v105_v25, %v58_v26 }
  0xa1   :  { %v61_v28 = vmax.f32 %v59_v27, 0.0 }
  0xa3   :  { %104 = vmatmul.msk.f32.vlgmr.msra.gmra.mxu1 %vm74_vm0, %v61_v28 }
 0x120   :  { %v95_v30 = vpop.f32.mrf.mxu1 }
 0x121   :  { %v96_v31 = vadd.f32 %v106_v29, %v95_v30 }
 0x123   :  { %v98_v32 = vmax.f32 %v96_v31, 0.0 }
 0x125   :  { %99 = vst [vmem:[%s226_s5] sm:$0xff] %v98_v32 }

</bundles_post_ra>
